<compile_context>
chip_gen: v6e
topology: v6e:2x2x1
jax: 0.10.0
libtpu: 0.0.40
codegen_flags: <defaults>
</compile_context>

<pallas_src>
import functools
from typing import NamedTuple

import jax
import jax.numpy as jnp
from jax.experimental import pallas as pl
from jax.experimental.pallas import tpu as pltpu

_LANE = 128


def _round_up(x, m):
    return ((x + m - 1) // m) * m


class ActorParams(NamedTuple):
    """Kernel-ready (pre-cast, pre-padded) Actor weights."""
    w1: jax.Array   # (obs_dim, H)   compute dtype
    b1: jax.Array   # (1, H)         f32
    w2: jax.Array   # (H, H)         compute dtype
    b2: jax.Array   # (1, H)         f32
    w3: jax.Array   # (H, act_p)     compute dtype, zero-padded columns
    b3: jax.Array   # (1, act_p)     f32, -1e30 on padded lanes


def prepare_actor_params(w1, b1, w2, b2, w3, b3, *, use_bf16=True):
    """One-time weight prep (cast + fc3 lane-padding). Do NOT call per step.

    Weights must already be in (in_features, out_features) layout.
    Returns (params, action_dim).
    """
    cdt = jnp.bfloat16 if use_bf16 else jnp.float32
    action_dim = w3.shape[1]
    act_p = _round_up(action_dim, _LANE)

    w3_pad = jnp.pad(w3.astype(cdt), ((0, 0), (0, act_p - action_dim)))
    b3_pad = jnp.pad(jnp.reshape(b3, (1, -1)).astype(jnp.float32),
                     ((0, 0), (0, act_p - action_dim)),
                     constant_values=-1e30)

    params = ActorParams(
        w1=w1.astype(cdt),
        b1=jnp.reshape(b1, (1, -1)).astype(jnp.float32),
        w2=w2.astype(cdt),
        b2=jnp.reshape(b2, (1, -1)).astype(jnp.float32),
        w3=w3_pad,
        b3=b3_pad,
    )
    return params, action_dim


def actor_kernel(obs_ref, w1_ref, b1_ref, w2_ref, b2_ref, w3_ref, b3_ref,
                 out_ref):
    # One batch tile per grid step; weights/biases have constant index_maps so
    # they stay VMEM-resident across the whole grid.
    cdt = w1_ref.dtype                                   # matmul input dtype

    x = obs_ref[...]                                     # (TB, obs_dim) cdt

    # fc1 + ReLU  (MXU accumulates in f32; down-cast fused into the ReLU)
    h1 = jnp.dot(x, w1_ref[...], preferred_element_type=jnp.float32)
    h1 = jnp.maximum(h1 + b1_ref[...], 0.0).astype(cdt)  # (TB, H)

    # fc2 + ReLU
    h2 = jnp.dot(h1, w2_ref[...], preferred_element_type=jnp.float32)
    h2 = jnp.maximum(h2 + b2_ref[...], 0.0).astype(cdt)  # (TB, H)

    # fc3 — padded output lanes carry a -1e30 bias, so exp() below is exactly 0
    logits = jnp.dot(h2, w3_ref[...], preferred_element_type=jnp.float32)
    logits = logits + b3_ref[...]                        # (TB, act_p) f32

    # numerically-stable softmax over the lane-dense (128-wide) last axis;
    # exact division so rows sum to 1 like torch.softmax.
    m = jnp.max(logits, axis=-1, keepdims=True)
    e = jnp.exp(logits - m)
    denom = jnp.sum(e, axis=-1, keepdims=True)
    out_ref[...] = (e / denom).astype(out_ref.dtype)


@functools.partial(jax.jit,
                   static_argnames=("action_dim", "tile_b", "out_dtype"))
def actor_forward(obs, params, *, action_dim, tile_b=None,
                  out_dtype=jnp.float32):
    """probs = softmax(fc3(relu(fc2(relu(fc1(obs)))))).  obs: (B, obs_dim)."""
    B, obs_dim = obs.shape
    cdt = params.w1.dtype
    act_p = params.w3.shape[1]

    # Batch-tile policy (B is static under jit, so this is trace-time Python).
    if tile_b is None:
        if B <= 256:
            # Single tile, only sublane-aligned: don't multiply VPU/EUP work
            # and output writeback 16x just to "fill" the MXU.
            tile_b = _round_up(B, 16)
        else:
            b_aligned = _round_up(B, 256)
            # >= 2 grid steps so the v7x megacore can split the batch; cap at
            # 1024 rows (a few MB of VMEM, well inside every generation).
            tile_b = min(1024, _round_up(b_aligned // 2, 256))
    b_pad = _round_up(B, tile_b)

    obs_c = obs.astype(cdt)
    if b_pad != B:
        obs_c = jnp.pad(obs_c, ((0, b_pad - B), (0, 0)))

    def full(a):
        # Whole (small) weight/bias array visible at every grid step.
        return pl.BlockSpec(a.shape, lambda i: (0,) * a.ndim)

    grid = (b_pad // tile_b,)

    out = pl.pallas_call(
        actor_kernel,
        out_shape=jax.ShapeDtypeStruct((b_pad, act_p), out_dtype),
        grid_spec=pltpu.PrefetchScalarGridSpec(
            num_scalar_prefetch=0,
            grid=grid,
            in_specs=[
                # obs at its TRUE feature width (block dim == full array dim).
                pl.BlockSpec((tile_b, obs_dim), lambda i: (i, 0)),
                full(params.w1), full(params.b1),
                full(params.w2), full(params.b2),
                full(params.w3), full(params.b3),
            ],
            out_specs=pl.BlockSpec((tile_b, act_p), lambda i: (i, 0)),
        ),
        compiler_params=pltpu.CompilerParams(
            dimension_semantics=("parallel",)),
    )(obs_c, params.w1, params.b1, params.w2, params.b2, params.w3, params.b3)

    return out[:B, :action_dim]


def reference_forward(obs, w1, b1, w2, b2, w3, b3, *, use_bf16=True):
    """Plain-JAX forward mirroring the kernel's dtype choices."""
    cdt = jnp.bfloat16 if use_bf16 else jnp.float32
    h = jnp.dot(obs.astype(cdt), w1.astype(cdt),
                preferred_element_type=jnp.float32) + b1
    h = jnp.maximum(h, 0.0).astype(cdt)
    h = jnp.dot(h, w2.astype(cdt), preferred_element_type=jnp.float32) + b2
    h = jnp.maximum(h, 0.0).astype(cdt)
    logits = jnp.dot(h, w3.astype(cdt),
                     preferred_element_type=jnp.float32) + b3
    return jax.nn.softmax(logits, axis=-1)


def init_linear(key, fan_in, fan_out):
    """PyTorch nn.Linear default init: U(-1/sqrt(fan_in), 1/sqrt(fan_in)).

    Returns weight as (fan_in, fan_out) — already transposed for `x @ W`.
    """
    kw, kb = jax.random.split(key)
    bound = 1.0 / jnp.sqrt(jnp.float32(fan_in))
    w = jax.random.uniform(kw, (fan_in, fan_out), jnp.float32, -bound, bound)
    b = jax.random.uniform(kb, (1, fan_out), jnp.float32, -bound, bound)
    return w, b


if __name__ == "__main__":
    OBS_DIM = 16
    ACTION_DIM = 8
    HIDDEN = 256          # fixed by the module spec (fc1/fc2 -> 256)
    BATCH = 16

    key = jax.random.PRNGKey(0)
    k_obs, k_obs2, k1, k2, k3 = jax.random.split(key, 5)

    obs = jax.random.normal(k_obs, (BATCH, OBS_DIM), jnp.float32)
    w1, b1 = init_linear(k1, OBS_DIM, HIDDEN)
    w2, b2 = init_linear(k2, HIDDEN, HIDDEN)
    w3, b3 = init_linear(k3, HIDDEN, ACTION_DIM)

    # One-time weight prep (cast + fc3 lane-padding) — hoisted out of the
    # per-call path.
    params, action_dim = prepare_actor_params(w1, b1, w2, b2, w3, b3)

    # Small batch: single 16-row tile, one grid step.
    probs = actor_forward(obs, params, action_dim=action_dim)
    probs = jax.block_until_ready(probs)
    ref = reference_forward(obs, w1, b1, w2, b2, w3, b3)

    assert probs.shape == (BATCH, ACTION_DIM)
    assert bool(jnp.all(jnp.isfinite(probs)))
    assert jnp.allclose(jnp.sum(probs, axis=-1), 1.0, atol=1e-3)
    assert jnp.allclose(probs, ref, atol=5e-3, rtol=0)

    # Ragged larger batch: 1000 rows -> two 512-row grid steps (megacore-able).
    obs2 = jax.random.normal(k_obs2, (1000, OBS_DIM), jnp.float32)
    probs2 = actor_forward(obs2, params, action_dim=action_dim)
    probs2 = jax.block_until_ready(probs2)
    ref2 = reference_forward(obs2, w1, b1, w2, b2, w3, b3)

    assert probs2.shape == (1000, ACTION_DIM)
    assert bool(jnp.all(jnp.isfinite(probs2)))
    assert jnp.allclose(jnp.sum(probs2, axis=-1), 1.0, atol=1e-3)
    assert jnp.allclose(probs2, ref2, atol=5e-3, rtol=0)

    print("KERNEL_OK")
</pallas_src>

<mosaic_0001>
module attributes {stable_mosaic.version = 11 : i64} {
  func.func @actor_kernel(%arg0: i32, %arg1: memref<16x16xbf16, #tpu.memory_space<vmem>>, %arg2: memref<16x256xbf16, #tpu.memory_space<vmem>>, %arg3: memref<1x256xf32, #tpu.memory_space<vmem>>, %arg4: memref<256x256xbf16, #tpu.memory_space<vmem>>, %arg5: memref<1x256xf32, #tpu.memory_space<vmem>>, %arg6: memref<256x128xbf16, #tpu.memory_space<vmem>>, %arg7: memref<1x128xf32, #tpu.memory_space<vmem>>, %arg8: memref<16x128xf32, #tpu.memory_space<vmem>>) attributes {dimension_semantics = [#tpu.dimension_semantics<parallel>], iteration_bounds = array<i64: 1>, scalar_prefetch = 0 : i64, scratch_operands = 0 : i64, tpu.core_type = #tpu.core_type<tc>, window_params = [{transform_indices = @transform_0, window_bounds = array<i64: 16, 16>}, {pipeline_mode = #tpu.pipeline_mode<synchronous>, transform_indices = @transform_1, window_bounds = array<i64: 16, 256>}, {pipeline_mode = #tpu.pipeline_mode<synchronous>, transform_indices = @transform_2, window_bounds = array<i64: 1, 256>}, {pipeline_mode = #tpu.pipeline_mode<synchronous>, transform_indices = @transform_3, window_bounds = array<i64: 256, 256>}, {pipeline_mode = #tpu.pipeline_mode<synchronous>, transform_indices = @transform_4, window_bounds = array<i64: 1, 256>}, {pipeline_mode = #tpu.pipeline_mode<synchronous>, transform_indices = @transform_5, window_bounds = array<i64: 256, 128>}, {pipeline_mode = #tpu.pipeline_mode<synchronous>, transform_indices = @transform_6, window_bounds = array<i64: 1, 128>}, {transform_indices = @transform_7, window_bounds = array<i64: 16, 128>}]} {
    %c0 = arith.constant 0 : index
    %c0_0 = arith.constant 0 : index
    %0 = vector.load %arg1[%c0, %c0_0] : memref<16x16xbf16, #tpu.memory_space<vmem>>, vector<16x16xbf16>
    %c0_1 = arith.constant 0 : index
    %c0_2 = arith.constant 0 : index
    %1 = vector.load %arg2[%c0_1, %c0_2] : memref<16x256xbf16, #tpu.memory_space<vmem>>, vector<16x256xbf16>
    %cst = arith.constant dense<0.000000e+00> : vector<16x256xf32>
    %2 = tpu.matmul %0, %1, %cst {dimension_numbers = #tpu.dot_dimension_numbers<[1], [0], [0], [1], [0, 0, 1, 1], [], []>} : vector<16x16xbf16>, vector<16x256xbf16>, vector<16x256xf32> -> vector<16x256xf32>
    %c0_3 = arith.constant 0 : index
    %c0_4 = arith.constant 0 : index
    %3 = vector.load %arg3[%c0_3, %c0_4] : memref<1x256xf32, #tpu.memory_space<vmem>>, vector<1x256xf32>
    %4 = vector.broadcast %3 : vector<1x256xf32> to vector<16x256xf32>
    %5 = arith.addf %2, %4 : vector<16x256xf32>
    %cst_5 = arith.constant 0.000000e+00 : f32
    %6 = vector.broadcast %cst_5 : f32 to vector<16x256xf32>
    %7 = arith.maximumf %5, %6 : vector<16x256xf32>
    %8 = arith.truncf %7 : vector<16x256xf32> to vector<16x256xbf16>
    %c0_6 = arith.constant 0 : index
    %c0_7 = arith.constant 0 : index
    %9 = vector.load %arg4[%c0_6, %c0_7] : memref<256x256xbf16, #tpu.memory_space<vmem>>, vector<256x256xbf16>
    %cst_8 = arith.constant dense<0.000000e+00> : vector<16x256xf32>
    %10 = tpu.matmul %8, %9, %cst_8 {dimension_numbers = #tpu.dot_dimension_numbers<[1], [0], [0], [1], [0, 0, 1, 1], [], []>} : vector<16x256xbf16>, vector<256x256xbf16>, vector<16x256xf32> -> vector<16x256xf32>
    %c0_9 = arith.constant 0 : index
    %c0_10 = arith.constant 0 : index
    %11 = vector.load %arg5[%c0_9, %c0_10] : memref<1x256xf32, #tpu.memory_space<vmem>>, vector<1x256xf32>
    %12 = vector.broadcast %11 : vector<1x256xf32> to vector<16x256xf32>
    %13 = arith.addf %10, %12 : vector<16x256xf32>
    %cst_11 = arith.constant 0.000000e+00 : f32
    %14 = vector.broadcast %cst_11 : f32 to vector<16x256xf32>
    %15 = arith.maximumf %13, %14 : vector<16x256xf32>
    %16 = arith.truncf %15 : vector<16x256xf32> to vector<16x256xbf16>
    %c0_12 = arith.constant 0 : index
    %c0_13 = arith.constant 0 : index
    %17 = vector.load %arg6[%c0_12, %c0_13] : memref<256x128xbf16, #tpu.memory_space<vmem>>, vector<256x128xbf16>
    %cst_14 = arith.constant dense<0.000000e+00> : vector<16x128xf32>
    %18 = tpu.matmul %16, %17, %cst_14 {dimension_numbers = #tpu.dot_dimension_numbers<[1], [0], [0], [1], [0, 0, 1, 1], [], []>} : vector<16x256xbf16>, vector<256x128xbf16>, vector<16x128xf32> -> vector<16x128xf32>
    %c0_15 = arith.constant 0 : index
    %c0_16 = arith.constant 0 : index
    %19 = vector.load %arg7[%c0_15, %c0_16] : memref<1x128xf32, #tpu.memory_space<vmem>>, vector<1x128xf32>
    %20 = vector.broadcast %19 : vector<1x128xf32> to vector<16x128xf32>
    %21 = arith.addf %18, %20 : vector<16x128xf32>
    %cst_17 = arith.constant dense<0xFF800000> : vector<16xf32>
    %22 = vector.multi_reduction <maximumf>, %21, %cst_17 [1] : vector<16x128xf32> to vector<16xf32>
    %23 = vector.shape_cast %22 : vector<16xf32> to vector<16x1xf32>
    %24 = vector.broadcast %23 : vector<16x1xf32> to vector<16x128xf32>
    %25 = arith.subf %21, %24 : vector<16x128xf32>
    %26 = math.exp %25 : vector<16x128xf32>
    %cst_18 = arith.constant dense<0.000000e+00> : vector<16xf32>
    %27 = vector.multi_reduction <add>, %26, %cst_18 [1] : vector<16x128xf32> to vector<16xf32>
    %28 = vector.shape_cast %27 : vector<16xf32> to vector<16x1xf32>
    %29 = vector.broadcast %28 : vector<16x1xf32> to vector<16x128xf32>
    %30 = arith.divf %26, %29 : vector<16x128xf32>
    %c0_19 = arith.constant 0 : index
    %c0_20 = arith.constant 0 : index
    %31 = vector.load %arg8[%c0_19, %c0_20] : memref<16x128xf32, #tpu.memory_space<vmem>>, vector<16x128xf32>
    tpu.vector_store %arg8[%c0_19, %c0_20], %30 {strides = array<i32>} : memref<16x128xf32, #tpu.memory_space<vmem>>, vector<16x128xf32>,
    return
  }
  func.func @transform_0(%arg0: i32) -> (i32, i32) {
    %c0_i32 = arith.constant 0 : i32
    %c0_i32_0 = arith.constant 0 : i32
    return %arg0, %c0_i32 : i32, i32
  }
  func.func @transform_1(%arg0: i32) -> (i32, i32) {
    %c0_i32 = arith.constant 0 : i32
    %c0_i32_0 = arith.constant 0 : i32
    %c0_i32_1 = arith.constant 0 : i32
    return %c0_i32, %c0_i32_0 : i32, i32
  }
  func.func @transform_2(%arg0: i32) -> (i32, i32) {
    %c0_i32 = arith.constant 0 : i32
    %c0_i32_0 = arith.constant 0 : i32
    %c0_i32_1 = arith.constant 0 : i32
    return %c0_i32, %c0_i32_0 : i32, i32
  }
  func.func @transform_3(%arg0: i32) -> (i32, i32) {
    %c0_i32 = arith.constant 0 : i32
    %c0_i32_0 = arith.constant 0 : i32
    %c0_i32_1 = arith.constant 0 : i32
    return %c0_i32, %c0_i32_0 : i32, i32
  }
  func.func @transform_4(%arg0: i32) -> (i32, i32) {
    %c0_i32 = arith.constant 0 : i32
    %c0_i32_0 = arith.constant 0 : i32
    %c0_i32_1 = arith.constant 0 : i32
    return %c0_i32, %c0_i32_0 : i32, i32
  }
  func.func @transform_5(%arg0: i32) -> (i32, i32) {
    %c0_i32 = arith.constant 0 : i32
    %c0_i32_0 = arith.constant 0 : i32
    %c0_i32_1 = arith.constant 0 : i32
    return %c0_i32, %c0_i32_0 : i32, i32
  }
  func.func @transform_6(%arg0: i32) -> (i32, i32) {
    %c0_i32 = arith.constant 0 : i32
    %c0_i32_0 = arith.constant 0 : i32
    %c0_i32_1 = arith.constant 0 : i32
    return %c0_i32, %c0_i32_0 : i32, i32
  }
  func.func @transform_7(%arg0: i32) -> (i32, i32) {
    %c0_i32 = arith.constant 0 : i32
    %c0_i32_0 = arith.constant 0 : i32
    return %arg0, %c0_i32 : i32, i32
  }
}

</mosaic_0001>

<bundles_post_ra>
// kernel: actor_forward.1
= control target key start
LH: loop header
LB: loop body
LE: loop exit
PB: predicated region body
PF: predicated region fallthrough
CT: control target
= control target key end

     0   :  { %12 = vsyncpa [#allocation3], 0  ;;  %s873_s0 = inlined_call_operand.vmem [shape: bf16[16,16], index: 0, kind: input, shape index: {}]   ;;  %s874_s1 = inlined_call_operand.vmem [shape: bf16[16,256], index: 1, kind: input, shape index: {}]   ;;  %s875_s2 = inlined_call_operand.vmem [shape: f32[1,256], index: 2, kind: input, shape index: {}]   ;;  %s876_s3 = inlined_call_operand.hbm [shape: bf16[256,256], index: 3, kind: input, shape index: {}]   ;;  %s877_s4 = inlined_call_operand.vmem [shape: f32[1,256], index: 4, kind: input, shape index: {}]   ;;  %s878_s5 = inlined_call_operand.hbm [shape: bf16[256,128], index: 5, kind: input, shape index: {}]   ;;  %s879_s6 = inlined_call_operand.vmem [shape: f32[1,128], index: 6, kind: input, shape index: {}]   ;;  %s880_s7 = inlined_call_operand.vmem [shape: f32[16,128], index: 7, kind: output, shape index: {}]  }
   0x1   :  { %13 = vsyncpa [#allocation5], 0  ;;  %s796_s24 = smov [#allocation2]  }
   0x2   :  { %s25_s25 = sshll.u32 %s796_s24, 4  ;;  %s26_s25 = int_to_ptr.vmem [resolvable:$true] %s25_s25 }
   0x3   :  { %s760_s26 = scalar_lea.vmem %s26_s25, 4096  ;;  %p765_p1 = scmp.lt.s32.totalorder %s26_s25, %s26_s25 }
   0x4   :  { %p761_p0 = scmp.ne.s32.totalorder %s26_s25, %s760_s26  ;;  %p766_p2 = scmp.lt.s32.totalorder %s760_s26, %s760_s26 }
   0x6   :  { %p767_p3 = por %p766_p2, %p765_p1 }
   0x8   :  { %p768_p4 = pnand %p767_p3, %p761_p0 }
   0xa   :  { %771 = shalt.err (!%p768_p4)
}
   0xb   :  { %s797_s27 = smov 128   ;;  %s798_s28 = smov 8  }
   0xc   :  { %31 = dma.hbm_to_vmem [thread:$0]  %s876_s3, 4096, %s26_s25, [#allocation3], %s797_s27, %s797_s27, %s798_s28  }
   0xd   :  { %s799_s8 = smov [#allocation4]  }
   0xe   :  { %s39_s9 = sshll.u32 %s799_s8, 4  ;;  %s40_s9 = int_to_ptr.vmem [resolvable:$true] %s39_s9 }
   0xf   :  { %s780_s10 = scalar_lea.vmem %s40_s9, 2048  ;;  %p785_p6 = scmp.lt.s32.totalorder %s40_s9, %s40_s9 }
  0x10   :  { %p781_p5 = scmp.ne.s32.totalorder %s40_s9, %s780_s10  ;;  %p786_p7 = scmp.lt.s32.totalorder %s780_s10, %s780_s10 }
  0x12   :  { %p787_p8 = por %p786_p7, %p785_p6 }
  0x14   :  { %p788_p9 = pnand %p787_p8, %p781_p5 }
  0x16   :  { %791 = shalt.err (!%p788_p9)
}
  0x17   :  { %s800_s11 = smov 64   ;;  %s801_s12 = smov 4  }
  0x18   :  { %45 = dma.hbm_to_vmem [thread:$0]  %s878_s5, 2048, %s40_s9, [#allocation5], %s800_s11, %s800_s11, %s801_s12  }
  0x19   :  { %792 = dma.done.wait [#allocation3], 4096  }
  0x1a   :  { %793 = vsyncadd [#allocation3], 4294963200 }
  0x1b   :  { %794 = dma.done.wait [#allocation5], 2048  }
  0x1c   :  { %795 = vsyncadd [#allocation5], 4294965248  ;;  %v802_v0 = vmov 0   ;;  %v676_v1 = vld [vmem:[%s874_s1 + $0x4] ss:$8 sps:$4 sm:$0xff]   ;;  %vm86_vm0 = vcmask 130048   ;;  %v61_v46 = vlaneseq }
  0x1d   :  { %122 = vmatprep.mubr.bf16.mxu0 %v802_v0  ;;  %v678_v2 = vld [vmem:[%s874_s1] ss:$8 sps:$4 sm:$0xff]   ;;  %104 = vmatprep.subr.bf16.mxu0 %v676_v1  ;;  %v680_v4 = vld [vmem:[#allocation2 + $0x74] ss:$8 sps:$4 sm:$0xff]   ;;  %v682_v5 = vld [vmem:[#allocation2 + $0x70] ss:$8 sps:$4 sm:$0xff]  }
  0x1e   :  { %v679_v3 = vld [vmem:[%s873_s0] sm:$0xff]   ;;  %105 = vmatpush1.bf16.msra.mxu0 %v678_v2  ;;  %343 = vmatprep.subr.bf16.mxu1 %v680_v4  ;;  %v686_v8 = vld [vmem:[#allocation2 + $0x54] ss:$8 sps:$4 sm:$0xff]   ;;  %v688_v9 = vld [vmem:[#allocation2 + $0x50] ss:$8 sps:$4 sm:$0xff]   ;;  %v62_v47 = vshrl.u32 %v61_v46, 7 }
  0x1f   :  { %v683_v6 = vld [vmem:[#allocation2 + $0x64] ss:$8 sps:$4 sm:$0xff]   ;;  %344 = vmatpush1.bf16.msra.mxu1 %v682_v5  ;;  %v685_v7 = vld [vmem:[#allocation2 + $0x60] ss:$8 sps:$4 sm:$0xff]   ;;  %v692_v12 = vld [vmem:[#allocation2 + $0x34] ss:$8 sps:$4 sm:$0xff]  }
  0x20   :  { %345 = vmatprep.subr.bf16.mxu1 %v683_v6  ;;  %v689_v10 = vld [vmem:[#allocation2 + $0x44] ss:$8 sps:$4 sm:$0xff]   ;;  %v691_v11 = vld [vmem:[#allocation2 + $0x40] ss:$8 sps:$4 sm:$0xff]   ;;  %v694_v13 = vld [vmem:[#allocation2 + $0x30] ss:$8 sps:$4 sm:$0xff]  }
  0x21   :  { %597 = vmatmul.mubr.msk.bf16.vlgmr.msra.gmra.mxu0 %vm86_vm0, %v679_v3  ;;  %v695_v14 = vld [vmem:[#allocation2 + $0x24] ss:$8 sps:$4 sm:$0xff]   ;;  %v697_v15 = vld [vmem:[#allocation2 + $0x20] ss:$8 sps:$4 sm:$0xff]   ;;  %v698_v16 = vld [vmem:[#allocation2 + $0x14] ss:$8 sps:$4 sm:$0xff]  }
  0x22   :  { %v700_v17 = vld [vmem:[#allocation2 + $0x10] ss:$8 sps:$4 sm:$0xff]   ;;  %v701_v18 = vld [vmem:[#allocation2 + $0x4] ss:$8 sps:$4 sm:$0xff]   ;;  %v703_v19 = vld [vmem:[#allocation2] ss:$8 sps:$4 sm:$0xff]  }
  0x23   :  { %346 = vmatpush1.bf16.msra.mxu1 %v685_v7  ;;  %v704_v20 = vld [vmem:[#allocation2 + $0xf4] ss:$8 sps:$4 sm:$0xff]   ;;  %v706_v21 = vld [vmem:[#allocation2 + $0xf0] ss:$8 sps:$4 sm:$0xff]   ;;  %v707_v22 = vld [vmem:[#allocation2 + $0xe4] ss:$8 sps:$4 sm:$0xff]  }
  0x24   :  { %347 = vmatprep.subr.bf16.mxu1 %v686_v8  ;;  %v709_v23 = vld [vmem:[#allocation2 + $0xe0] ss:$8 sps:$4 sm:$0xff]   ;;  %v710_v24 = vld [vmem:[#allocation2 + $0xd4] ss:$8 sps:$4 sm:$0xff]   ;;  %v712_v25 = vld [vmem:[#allocation2 + $0xd0] ss:$8 sps:$4 sm:$0xff]  }
  0x25   :  { %v713_v26 = vld [vmem:[#allocation2 + $0xc4] ss:$8 sps:$4 sm:$0xff]   ;;  %v715_v27 = vld [vmem:[#allocation2 + $0xc0] ss:$8 sps:$4 sm:$0xff]   ;;  %v716_v28 = vld [vmem:[#allocation2 + $0xb4] ss:$8 sps:$4 sm:$0xff]  }
  0x26   :  { %v718_v29 = vld [vmem:[#allocation2 + $0xb0] ss:$8 sps:$4 sm:$0xff]   ;;  %v719_v30 = vld [vmem:[#allocation2 + $0xa4] ss:$8 sps:$4 sm:$0xff]   ;;  %v721_v31 = vld [vmem:[#allocation2 + $0xa0] ss:$8 sps:$4 sm:$0xff]  }
  0x27   :  { %348 = vmatpush1.bf16.msra.mxu1 %v688_v9  ;;  %v722_v32 = vld [vmem:[#allocation2 + $0x94] ss:$8 sps:$4 sm:$0xff]   ;;  %v724_v33 = vld [vmem:[#allocation2 + $0x90] ss:$8 sps:$4 sm:$0xff]   ;;  %v725_v34 = vld [vmem:[#allocation2 + $0x84] ss:$8 sps:$4 sm:$0xff]  }
  0x28   :  { %349 = vmatprep.subr.bf16.mxu1 %v689_v10  ;;  %v727_v35 = vld [vmem:[#allocation2 + $0x80] ss:$8 sps:$4 sm:$0xff]   ;;  %v728_v36 = vld [vmem:[#allocation4 + $0x78] sm:$0xff]   ;;  %v730_v38 = vld [vmem:[#allocation4 + $0x70] sm:$0xff]   ;;  %v67_v48 = vsub.s32 1, %v62_v47  ;;  %v63_v49 = vsub.s32 0, %v62_v47 }
  0x29   :  { %v729_v37 = vld [vmem:[#allocation4 + $0x38] sm:$0xff]   ;;  %647 = vmatprep.subr.bf16.mxu0 %v728_v36  ;;  %v731_v39 = vld [vmem:[#allocation4 + $0x30] sm:$0xff]   ;;  %v732_v40 = vld [vmem:[#allocation4 + $0x68] sm:$0xff]  }
  0x2a   :  { %648 = vmatpush3.bf16.msra.mxu0 %v729_v37  ;;  %v733_v41 = vld [vmem:[#allocation4 + $0x28] sm:$0xff]   ;;  %v734_v42 = vld [vmem:[#allocation4 + $0x60] sm:$0xff]   ;;  %v736_v44 = vld [vmem:[#allocation4 + $0x58] sm:$0xff]  }
  0x2b   :  { %350 = vmatpush1.bf16.msra.mxu1 %v691_v11  ;;  %649 = vmatprep.subr.bf16.mxu0 %v730_v38  ;;  %v735_v43 = vld [vmem:[#allocation4 + $0x20] sm:$0xff]   ;;  %v737_v45 = vld [vmem:[#allocation4 + $0x18] sm:$0xff]   ;;  %v738_v3 = vld [vmem:[#allocation4 + $0x50] sm:$0xff]  }
  0x2c   :  { %351 = vmatprep.subr.bf16.mxu1 %v692_v12  ;;  %v59_v50 = vld [vmem:[%s875_s2] sm:$0x3]  ;;  %v739_v4 = vld [vmem:[#allocation4 + $0x10] sm:$0xff]   ;;  %v740_v5 = vld [vmem:[#allocation4 + $0x48] sm:$0xff]  }
  0x2d   :  { %v68_v52 = vrot.slane %v59_v50, %v67_v48  ;;  %v64_v53 = vrot.slane %v59_v50, %v63_v49  ;;  %v741_v6 = vld [vmem:[#allocation4 + $0x8] sm:$0xff]   ;;  %v742_v7 = vld [vmem:[#allocation4 + $0x40] sm:$0xff]  }
  0x2e   :  { %650 = vmatpush3.bf16.msra.mxu0 %v731_v39  ;;  %v743_v8 = vld [vmem:[#allocation4] sm:$0xff]  }
  0x2f   :  { %352 = vmatpush1.bf16.msra.mxu1 %v694_v13  ;;  %651 = vmatprep.subr.bf16.mxu0 %v732_v40  ;;  %v171_v9 = vld [vmem:[%s877_s4] sm:$0x3] }
  0x30   :  { %353 = vmatprep.subr.bf16.mxu1 %v695_v14  ;;  %v180_v11 = vrot.slane %v171_v9, %v67_v48  ;;  %v176_v12 = vrot.slane %v171_v9, %v63_v49 }
  0x32   :  { %652 = vmatpush3.bf16.msra.mxu0 %v733_v41 }
  0x33   :  { %354 = vmatpush1.bf16.msra.mxu1 %v697_v15  ;;  %653 = vmatprep.subr.bf16.mxu0 %v734_v42 }
  0x34   :  { %355 = vmatprep.subr.bf16.mxu1 %v698_v16 }
  0x36   :  { %654 = vmatpush3.bf16.msra.mxu0 %v735_v43 }
  0x37   :  { %356 = vmatpush1.bf16.msra.mxu1 %v700_v17  ;;  %655 = vmatprep.subr.bf16.mxu0 %v736_v44 }
  0x38   :  { %357 = vmatprep.subr.bf16.mxu1 %v701_v18 }
  0x3a   :  { %656 = vmatpush3.bf16.msra.mxu0 %v737_v45 }
  0x3b   :  { %358 = vmatpush1.bf16.msra.mxu1 %v703_v19  ;;  %657 = vmatprep.subr.bf16.mxu0 %v738_v3 }
  0x3c   :  { %359 = vmatprep.subr.bf16.mxu1 %v704_v20 }
  0x3e   :  { %658 = vmatpush3.bf16.msra.mxu0 %v739_v4 }
  0x3f   :  { %360 = vmatpush2.bf16.msra.mxu1 %v706_v21  ;;  %659 = vmatprep.subr.bf16.mxu0 %v740_v5 }
  0x40   :  { %361 = vmatprep.subr.bf16.mxu1 %v707_v22 }
  0x42   :  { %660 = vmatpush3.bf16.msra.mxu0 %v741_v6 }
  0x43   :  { %362 = vmatpush2.bf16.msra.mxu1 %v709_v23  ;;  %661 = vmatprep.subr.bf16.mxu0 %v742_v7 }
  0x44   :  { %363 = vmatprep.subr.bf16.mxu1 %v710_v24 }
  0x46   :  { %662 = vmatpush3.bf16.msra.mxu0 %v743_v8 }
  0x47   :  { %364 = vmatpush2.bf16.msra.mxu1 %v712_v25 }
  0x48   :  { %365 = vmatprep.subr.bf16.mxu1 %v713_v26 }
  0x4b   :  { %366 = vmatpush2.bf16.msra.mxu1 %v715_v27 }
  0x4c   :  { %367 = vmatprep.subr.bf16.mxu1 %v716_v28  ;;  %v630_v28 = vld [vmem:[%s879_s6] ss:$0 sm:$0xff] }
  0x4f   :  { %368 = vmatpush2.bf16.msra.mxu1 %v718_v29 }
  0x50   :  { %369 = vmatprep.subr.bf16.mxu1 %v719_v30 }
  0x53   :  { %370 = vmatpush2.bf16.msra.mxu1 %v721_v31 }
  0x54   :  { %371 = vmatprep.subr.bf16.mxu1 %v722_v32 }
  0x57   :  { %372 = vmatpush2.bf16.msra.mxu1 %v724_v33 }
  0x58   :  { %373 = vmatprep.subr.bf16.mxu1 %v725_v34 }
  0x5b   :  { %374 = vmatpush2.bf16.msra.mxu1 %v727_v35 }
  0xe1   :  { %v124_v51 = vpop.f32.mrf.mxu0 }
  0xe2   :  { %v125_v58 = vadd.f32 %v124_v51, %v64_v53 }
  0xe3   :  { %v126_v54 = vpop.f32.mrf.mxu0 }
  0xe4   :  { %v127_v56 = vadd.f32 %v126_v54, %v68_v52  ;;  %v133_v0 = vmax.f32 %v125_v58, 0.0 }
  0xe5   :  { %v128_v55 = vpop.f32.mrf.mxu0 }
  0xe6   :  { %v129_v57 = vadd.f32 %v128_v55, %v64_v53  ;;  %v134_v62 = vmax.f32 %v127_v56, 0.0 }
  0xe7   :  { %v130_v59 = vpop.f32.mrf.mxu0 }
  0xe8   :  { %v131_v60 = vadd.f32 %v130_v59, %v68_v52  ;;  %v135_v61 = vmax.f32 %v129_v57, 0.0 }
  0xea   :  { %v136_v63 = vmax.f32 %v131_v60, 0.0  ;;  %v137_v2 = vpack.c.bf16 %v135_v61, %v133_v0 }
  0xec   :  { %v138_v1 = vpack.c.bf16 %v136_v63, %v134_v62 }
  0xee   :  { %375 = vmatprep.mubr.bf16.mxu1 %v138_v1 }
  0xef   :  { %376 = vmatmul.mubr.bf16.vlgmr.msra.gmra.mxu1 %v137_v2 }
 0x1af   :  { %v377_v10 = vpop.f32.mrf.mxu1 }
 0x1b0   :  { %v378_v17 = vadd.f32 %v377_v10, %v176_v12 }
 0x1b1   :  { %v379_v13 = vpop.f32.mrf.mxu1 }
 0x1b2   :  { %v380_v15 = vadd.f32 %v379_v13, %v180_v11  ;;  %v386_v23 = vmax.f32 %v378_v17, 0.0 }
 0x1b3   :  { %v381_v14 = vpop.f32.mrf.mxu1 }
 0x1b4   :  { %v382_v16 = vadd.f32 %v381_v14, %v176_v12  ;;  %v387_v21 = vmax.f32 %v380_v15, 0.0 }
 0x1b5   :  { %v383_v18 = vpop.f32.mrf.mxu1 }
 0x1b6   :  { %v384_v19 = vadd.f32 %v383_v18, %v180_v11  ;;  %v388_v20 = vmax.f32 %v382_v16, 0.0 }
 0x1b8   :  { %v389_v22 = vmax.f32 %v384_v19, 0.0  ;;  %v390_v25 = vpack.c.bf16 %v388_v20, %v386_v23 }
 0x1ba   :  { %v391_v24 = vpack.c.bf16 %v389_v22, %v387_v21 }
 0x1bc   :  { %559 = vmatprep.mubr.bf16.mxu0 %v391_v24 }
 0x1bd   :  { %560 = vmatmul.mubr.bf16.vlgmr.msra.gmra.mxu0 %v390_v25 }
 0x27d   :  { %v663_v26 = vpop.f32.mrf.mxu0 }
 0x27f   :  { %v664_v27 = vpop.f32.mrf.mxu0 }
 0x280   :  { %v665_v29 = vadd.f32 %v664_v27, %v663_v26 }
 0x281   :  { %v666_v30 = vpop.f32.mrf.mxu0 }
 0x282   :  { %v562_v31 = vadd.f32 %v665_v29, %v630_v28 }
 0x283   :  { %v667_v32 = vpop.f32.mrf.mxu0 }
 0x284   :  { %v668_v33 = vadd.f32 %v667_v32, %v666_v30  ;;  %568 = vmax.xlane.f32.xlu0 %v562_v31 }
 0x286   :  { %v565_v34 = vadd.f32 %v668_v33, %v630_v28 }
 0x288   :  { %570 = vmax.xlane.f32.xlu0 %v565_v34 }
 0x30d   :  { %v569_v35 = vpop.xlane.xlu0 %568 }
 0x30e   :  { %v572_v36 = vsub.f32 %v562_v31, %v569_v35 }
 0x310   :  { %v574_v37 = vmul.f32 1.442695, %v572_v36 }
 0x311   :  { %v571_v38 = vpop.xlane.xlu0 %570 }
 0x312   :  { %744 = vpow2.f32 %v574_v37  ;;  %v573_v39 = vsub.f32 %v565_v34, %v571_v38 }
 0x314   :  { %v576_v40 = vmul.f32 1.442695, %v573_v39 }
 0x316   :  { %746 = vpow2.f32 %v576_v40 }
 0x31f   :  { %v745_v41 = vpop.eup %744 }
 0x320   :  { %578 = vadd.xlane.f32.xlu1 %v745_v41 }
 0x323   :  { %v747_v42 = vpop.eup %746 }
 0x324   :  { %580 = vadd.xlane.f32.xlu1 %v747_v42 }
 0x3a9   :  { %v579_v43 = vpop.xlane.xlu1 %578 }
 0x3aa   :  { %748 = vrcp.f32 %v579_v43 }
 0x3ad   :  { %v581_v44 = vpop.xlane.xlu1 %580 }
 0x3ae   :  { %750 = vrcp.f32 %v581_v44 }
 0x3b7   :  { %v749_v45 = vpop.eup %748 }
 0x3b8   :  { %v583_v46 = vmul.f32 %v749_v45, %v745_v41 }
 0x3ba   :  { %586 = vst [vmem:[%s880_s7] sm:$0xff] %v583_v46 }
 0x3bb   :  { %v751_v47 = vpop.eup %750 }
 0x3bc   :  { %v585_v48 = vmul.f32 %v751_v47, %v747_v42 }
 0x3be   :  { %587 = vst [vmem:[%s880_s7 + $0x8] sm:$0xff] %v585_v48 }
 0x3bf   :  { %592 = vsyncpa [#allocation3], 1 }
 0x3c0   :  { %593 = vsyncpa [#allocation5], 1 }

</bundles_post_ra>
